<compile_context>
chip_gen: v6e
topology: v6e:2x2x1
jax: 0.10.0
libtpu: 0.0.40
codegen_flags: <defaults>
</compile_context>

<pallas_src>
import functools

import jax
import jax.numpy as jnp
from jax.experimental import pallas as pl
from jax.experimental.pallas import tpu as pltpu


_LANE_CHOICES = (1024, 512, 256, 128)   # lane-dense last dims (multiples of 128)
_BLOCK_BYTES = 8 * 1024 * 1024          # ~8 MiB per block (amortizes step overhead)
_VMEM_LIMIT = 48 << 20                  # 2x(in+out) at 8 MiB blocks = 32 MiB < 48 MiB
_SMALL_BYTES = 256 * 1024               # below this, fused XLA elementwise wins


def _cdiv(a, b):
    return -(-a // b)


def _round_up(x, m):
    return _cdiv(x, m) * m


def _sublane_multiple(dtype):
    return {4: 8, 2: 16, 1: 32}.get(jnp.dtype(dtype).itemsize, 8)


def _device_kind():
    try:
        return jax.devices()[0].device_kind.lower()
    except Exception:
        return ""


def _lambda_kernel(func, compute_dtype, x_ref, o_ref):
    # Elementwise hot path: apply `func` to the whole VMEM tile.
    x = x_ref[...]
    if compute_dtype is not None:
        x = x.astype(compute_dtype)
    o_ref[...] = func(x).astype(o_ref.dtype)


class PallasLambda:
    """Pallas equivalent of the PyTorch `Lambda` module.

    `func` must be a JAX-traceable function.  Elementwise (shape-preserving)
    funcs on inputs >= 256 KiB run through the Pallas streaming kernel; tiny
    inputs and non-shape-preserving funcs fall back to the plain func (same
    semantics, XLA-fused).
    """

    def __init__(self, func):
        self.func = func
        self._cache = {}  # (shape, dtype) -> jitted runner

    def _build(self, shape, dtype, out_dtype):
        n = 1
        for d in shape:
            n *= int(d)
        in_item = jnp.dtype(dtype).itemsize
        out_item = jnp.dtype(out_dtype).itemsize
        kind = _device_kind()

        # Lane-dense bulk + (<128,) plain-JAX tail (no whole-array padding).
        lanes = None
        for cand in _LANE_CHOICES:
            if n % cand == 0:
                lanes = cand
                break
        if lanes is None:
            n_main = (n // 128) * 128
            lanes = 128
            for cand in _LANE_CHOICES:
                if n_main % cand == 0:
                    lanes = cand
                    break
        else:
            n_main = n
        tail = n - n_main
        rows = n_main // lanes

        # Sublane multiple must satisfy both input and output dtype layouts.
        sub = max(_sublane_multiple(dtype), _sublane_multiple(out_dtype))

        # ~8 MiB blocks, but keep >= 4 grid steps when rows allow (steady-state
        # pipelining; >= 2 steps per TensorCore on v7x).
        target_rows = max(
            sub, (_BLOCK_BYTES // (lanes * max(in_item, out_item))) // sub * sub
        )
        steps_cap = max(sub, _round_up(_cdiv(rows, 4), sub))
        tile_r = max(sub, min(target_rows, steps_cap, _round_up(rows, sub)))
        grid = (_cdiv(rows, tile_r),)

        # v5-and-older chips lack a bf16 VPU/EUP path; fp16 is never native.
        is_small_float = jnp.issubdtype(dtype, jnp.floating) and in_item < 4
        old_chip = ("v5" in kind) or ("v4" in kind) or ("v3" in kind) or (kind == "")
        compute_dtype = None
        if is_small_float and (old_chip or jnp.dtype(dtype) == jnp.float16):
            compute_dtype = jnp.float32

        # Only CORE_PARALLEL actually shards the grid across v7x's two TCs;
        # on single-TC chips keep plain "parallel".
        dim_sem = (pltpu.CORE_PARALLEL,) if "v7" in kind else ("parallel",)

        kernel = functools.partial(_lambda_kernel, self.func, compute_dtype)

        call = pl.pallas_call(
            kernel,
            out_shape=jax.ShapeDtypeStruct((rows, lanes), out_dtype),
            grid_spec=pltpu.PrefetchScalarGridSpec(
                num_scalar_prefetch=0,
                grid=grid,
                in_specs=[pl.BlockSpec((tile_r, lanes), lambda i: (i, 0))],
                out_specs=pl.BlockSpec((tile_r, lanes), lambda i: (i, 0)),
            ),
            compiler_params=pltpu.CompilerParams(
                dimension_semantics=dim_sem,
                vmem_limit_bytes=_VMEM_LIMIT,
            ),
            cost_estimate=pl.CostEstimate(
                flops=n_main,
                transcendentals=n_main,
                bytes_accessed=n_main * (in_item + out_item),
            ),
        )

        func = self.func

        def run(x):
            flat = x.reshape(-1)
            if tail:
                bulk = flat[:n_main].reshape(rows, lanes)
            else:
                bulk = flat.reshape(rows, lanes)  # contiguous: free re-view
            out = call(bulk).reshape(-1)
            if tail:
                out = jnp.concatenate([out, func(flat[n_main:])])
            return out.reshape(shape)

        return jax.jit(run)

    def __call__(self, x):
        x = jnp.asarray(x)
        try:
            out_aval = jax.eval_shape(
                self.func, jax.ShapeDtypeStruct(x.shape, x.dtype)
            )
            shape_preserving = (
                hasattr(out_aval, "shape")
                and tuple(out_aval.shape) == tuple(x.shape)
            )
            out_dtype = out_aval.dtype if shape_preserving else x.dtype
        except Exception:
            shape_preserving, out_dtype = False, x.dtype

        # Tiny / empty inputs or non-elementwise funcs: plain (XLA-fused) func.
        if x.size == 0 or x.nbytes < _SMALL_BYTES or not shape_preserving:
            return self.func(x)

        key = (x.shape, x.dtype)
        fn = self._cache.get(key)
        if fn is None:
            fn = self._build(x.shape, x.dtype, out_dtype)
            self._cache[key] = fn
        return fn(x)


if __name__ == "__main__":
    # Concrete example func (elementwise, JAX-traceable): SiLU.
    func = lambda x: x * jax.nn.sigmoid(x)
    lam = PallasLambda(func)

    key = jax.random.PRNGKey(0)
    k0, k1, k2, k3 = jax.random.split(key, 4)

    # 1) Small NCHW input consistent with typical module use (bypass path:
    #    tiny tensors go through the fused XLA func, not the kernel).
    x = jax.random.normal(k0, (2, 4, 16, 16), dtype=jnp.float32)
    y = lam(x)
    jax.block_until_ready(y)
    assert y.shape == x.shape and y.dtype == x.dtype
    assert jnp.allclose(y, func(x), atol=1e-6, rtol=1e-6)

    # 2) Moderate feature-map: exercises the Pallas kernel (lane-dense 1024,
    #    multi-step grid, no padding).
    x2 = jax.random.normal(k1, (2, 8, 128, 128), dtype=jnp.float32)
    y2 = lam(x2)
    jax.block_until_ready(y2)
    assert jnp.allclose(y2, func(x2), atol=1e-6, rtol=1e-6)

    # 3) Non-128-divisible size: Pallas bulk + tiny plain-JAX tail epilogue.
    x3 = jax.random.normal(k2, (3, 5, 97, 101), dtype=jnp.float32)
    y3 = lam(x3)
    jax.block_until_ready(y3)
    assert jnp.allclose(y3, func(x3), atol=1e-6, rtol=1e-6)

    # 4) bf16 input: native bf16 compute on v6e/v7x, f32 upcast on older chips.
    x4 = jax.random.normal(k3, (2, 8, 96, 128)).astype(jnp.bfloat16)
    y4 = lam(x4)
    jax.block_until_ready(y4)
    assert y4.dtype == jnp.bfloat16
    assert jnp.allclose(
        y4.astype(jnp.float32), func(x4).astype(jnp.float32), atol=2e-2, rtol=2e-2
    )

    print("KERNEL_OK")
</pallas_src>

<mosaic_0001>
module attributes {stable_mosaic.version = 11 : i64} {
  func.func @_lambda_kernel(%arg0: i32, %arg1: memref<64x1024xf32, #tpu.memory_space<vmem>>, %arg2: memref<64x1024xf32, #tpu.memory_space<vmem>>) attributes {dimension_semantics = [#tpu.dimension_semantics<parallel>], iteration_bounds = array<i64: 4>, scalar_prefetch = 0 : i64, scratch_operands = 0 : i64, tpu.core_type = #tpu.core_type<tc>, window_params = [{transform_indices = @transform_0, window_bounds = array<i64: 64, 1024>}, {transform_indices = @transform_1, window_bounds = array<i64: 64, 1024>}]} {
    %c0 = arith.constant 0 : index
    %c0_0 = arith.constant 0 : index
    %0 = vector.load %arg1[%c0, %c0_0] : memref<64x1024xf32, #tpu.memory_space<vmem>>, vector<64x1024xf32>
    %1 = arith.negf %0 : vector<64x1024xf32>
    %2 = math.exp %1 : vector<64x1024xf32>
    %cst = arith.constant 1.000000e+00 : f32
    %3 = vector.broadcast %cst : f32 to vector<64x1024xf32>
    %4 = arith.addf %3, %2 : vector<64x1024xf32>
    %5 = arith.divf %3, %4 : vector<64x1024xf32>
    %6 = arith.mulf %0, %5 : vector<64x1024xf32>
    %c0_1 = arith.constant 0 : index
    %c0_2 = arith.constant 0 : index
    %7 = vector.load %arg2[%c0_1, %c0_2] : memref<64x1024xf32, #tpu.memory_space<vmem>>, vector<64x1024xf32>
    tpu.vector_store %arg2[%c0_1, %c0_2], %6 {strides = array<i32>} : memref<64x1024xf32, #tpu.memory_space<vmem>>, vector<64x1024xf32>,
    return
  }
  func.func @transform_0(%arg0: i32) -> (i32, i32) {
    %c0_i32 = arith.constant 0 : i32
    %c0_i32_0 = arith.constant 0 : i32
    return %arg0, %c0_i32 : i32, i32
  }
  func.func @transform_1(%arg0: i32) -> (i32, i32) {
    %c0_i32 = arith.constant 0 : i32
    %c0_i32_0 = arith.constant 0 : i32
    return %arg0, %c0_i32 : i32, i32
  }
}

</mosaic_0001>

<bundles_post_ra>
// kernel: run.1
= control target key start
LH: loop header
LB: loop body
LE: loop exit
PB: predicated region body
PF: predicated region fallthrough
CT: control target
= control target key end

     0   :  { %s1120_s6 = smov 0   ;;  %s1532_s0 = inlined_call_operand.vmem [shape: f32[256,1024], index: 0, kind: input, shape index: {}]   ;;  %s1533_s1 = inlined_call_operand.vmem [shape: f32[256,1024], index: 1, kind: output, shape index: {}]  }
   0x1 LB: > { %s759_s7 = sadd.s32 4294967295, %s1108_s6   ;;  %p763_p0 = scmp.ge.s32.totalorder %s1108_s6, 1  ;;  %s1108_s6 = sphi %s1120_s6, %s11_s6  }
   0x2   : > { %p89_p1 = scmp.lt.s32.totalorder %s1108_s6, 5 }
   0x4   : > { %p90_p2 = pnand %p763_p0, %p89_p1 }
   0x5   : > { %s764_s8 = sshll.u32 (!%p90_p2), %s759_s7, 3 }
   0x6   : > { %93 = sbr.rel (%p90_p2) target bundleno = 161 (0xa1), region = 24  ;;  %p112_p3 = scmp.lt.s32.totalorder (!%p90_p2), %s764_s8, 31 }
   0xb   : > { %s1535_s8 = smov (!%p112_p3, %s764_s8), 31 }
   0xc   : > { %s836_s9 = sshll.u32 %s1535_s8, 6 }
   0xd   : > { %s1136_s12 = scalar_lea.vmem %s1532_s0, %s836_s9  ;;  %s1220_s15 = scalar_lea.vmem %s1533_s1, %s836_s9 }
   0xe   : > { %v1139_v0 = vld [vmem:[%s1136_s12] sm:$0xff]  ;;  %v1142_v1 = vld [vmem:[%s1136_s12 + $0x8] sm:$0xff]  ;;  %v1145_v2 = vld [vmem:[%s1136_s12 + $0x10] sm:$0xff] }
   0xf   : > { %v770_v3 = vmul.f32 -1.442695, %v1139_v0  ;;  %v771_v4 = vmul.f32 -1.442695, %v1142_v1  ;;  %v772_v5 = vmul.f32 -1.442695, %v1145_v2 }
  0x10   : > { %v1151_v6 = vld [vmem:[%s1136_s12 + $0x18] sm:$0xff]  ;;  %v1154_v7 = vld [vmem:[%s1136_s12 + $0x20] sm:$0xff]  ;;  %v1157_v8 = vld [vmem:[%s1136_s12 + $0x28] sm:$0xff] }
  0x11   : > { %846 = vpow2.f32 %v770_v3  ;;  %v773_v9 = vmul.f32 -1.442695, %v1151_v6  ;;  %v774_v10 = vmul.f32 -1.442695, %v1154_v7  ;;  %v775_v11 = vmul.f32 -1.442695, %v1157_v8 }
  0x12   : > { %848 = vpow2.f32 %v771_v4  ;;  %v1163_v12 = vld [vmem:[%s1136_s12 + $0x30] sm:$0xff]  ;;  %v1166_v13 = vld [vmem:[%s1136_s12 + $0x38] sm:$0xff]  ;;  %v1169_v14 = vld [vmem:[%s1136_s12 + $0x40] sm:$0xff] }
  0x13   : > { %850 = vpow2.f32 %v772_v5  ;;  %v776_v15 = vmul.f32 -1.442695, %v1163_v12  ;;  %v777_v16 = vmul.f32 -1.442695, %v1166_v13  ;;  %v1174_v17 = vld [vmem:[%s1136_s12 + $0x48] sm:$0xff]  ;;  %v1177_v18 = vld [vmem:[%s1136_s12 + $0x50] sm:$0xff] }
  0x14   : > { %852 = vpow2.f32 %v773_v9  ;;  %v778_v19 = vmul.f32 -1.442695, %v1169_v14  ;;  %v1181_v20 = vld [vmem:[%s1136_s12 + $0x58] sm:$0xff]  ;;  %v779_v21 = vmul.f32 -1.442695, %v1174_v17  ;;  %v1185_v22 = vld [vmem:[%s1136_s12 + $0x60] sm:$0xff] }
  0x15   : > { %854 = vpow2.f32 %v774_v10  ;;  %v780_v23 = vmul.f32 -1.442695, %v1177_v18  ;;  %v1189_v24 = vld [vmem:[%s1136_s12 + $0x68] sm:$0xff]  ;;  %v781_v25 = vmul.f32 -1.442695, %v1181_v20  ;;  %v1193_v26 = vld [vmem:[%s1136_s12 + $0x70] sm:$0xff] }
  0x16   : > { %856 = vpow2.f32 %v775_v11  ;;  %v782_v27 = vmul.f32 -1.442695, %v1185_v22  ;;  %v1197_v28 = vld [vmem:[%s1136_s12 + $0x78] sm:$0xff]  ;;  %v783_v29 = vmul.f32 -1.442695, %v1189_v24  ;;  %v1203_v57 = vld [vmem:[%s1136_s12 + $0x80] sm:$0xff] }
  0x17   : > { %858 = vpow2.f32 %v776_v15  ;;  %v784_v30 = vmul.f32 -1.442695, %v1193_v26  ;;  %v785_v31 = vmul.f32 -1.442695, %v1197_v28  ;;  %v1206_v60 = vld [vmem:[%s1136_s12 + $0x88] sm:$0xff]  ;;  %v1209_v63 = vld [vmem:[%s1136_s12 + $0x90] sm:$0xff] }
  0x18   : > { %860 = vpow2.f32 %v777_v16  ;;  %v786_v5 = vmul.f32 -1.442695, %v1203_v57  ;;  %v1213_v9 = vld [vmem:[%s1136_s12 + $0x98] sm:$0xff]  ;;  %v787_v15 = vmul.f32 -1.442695, %v1206_v60  ;;  %v1224_v16 = vld [vmem:[%s1136_s12 + $0xa0] sm:$0xff] }
  0x19   : > { %862 = vpow2.f32 %v778_v19 }
  0x1a   : > { %864 = vpow2.f32 %v779_v21 }
  0x1b   : > { %866 = vpow2.f32 %v780_v23  ;;  %v788_v23 = vmul.f32 -1.442695, %v1209_v63 }
  0x1c   : > { %868 = vpow2.f32 %v781_v25  ;;  %v1229_v25 = vld [vmem:[%s1136_s12 + $0xa8] sm:$0xff] }
  0x1d   : > { %870 = vpow2.f32 %v782_v27 }
  0x1e   : > { %v847_v32 = vpop.eup %846  ;;  %872 = vpow2.f32 %v783_v29 }
  0x1f   : > { %v849_v33 = vpop.eup %848  ;;  %v381_v34 = vadd.f32 1.0, %v847_v32  ;;  %874 = vpow2.f32 %v784_v30  ;;  %v789_v30 = vmul.f32 -1.442695, %v1213_v9 }
  0x20   : > { %v851_v35 = vpop.eup %850  ;;  %v382_v36 = vadd.f32 1.0, %v849_v33  ;;  %876 = vpow2.f32 %v785_v31  ;;  %v1234_v31 = vld [vmem:[%s1136_s12 + $0xb0] sm:$0xff]  ;;  %v790_v33 = vmul.f32 -1.442695, %v1224_v16 }
  0x21   : > { %v853_v37 = vpop.eup %852  ;;  %878 = vrcp.f32 %v381_v34  ;;  %v383_v38 = vadd.f32 1.0, %v851_v35  ;;  %v1240_v34 = vld [vmem:[%s1136_s12 + $0xb8] sm:$0xff] }
  0x22   : > { %v855_v39 = vpop.eup %854  ;;  %880 = vrcp.f32 %v382_v36  ;;  %v384_v40 = vadd.f32 1.0, %v853_v37  ;;  %v791_v36 = vmul.f32 -1.442695, %v1229_v25  ;;  %v1246_v37 = vld [vmem:[%s1136_s12 + $0xc0] sm:$0xff] }
  0x23   : > { %v857_v41 = vpop.eup %856  ;;  %882 = vrcp.f32 %v383_v38  ;;  %v385_v42 = vadd.f32 1.0, %v855_v39  ;;  %v792_v39 = vmul.f32 -1.442695, %v1234_v31 }
  0x24   : > { %v859_v43 = vpop.eup %858  ;;  %884 = vrcp.f32 %v384_v40  ;;  %v386_v44 = vadd.f32 1.0, %v857_v41  ;;  %v1252_v40 = vld [vmem:[%s1136_s12 + $0xc8] sm:$0xff] }
  0x25   : > { %v861_v45 = vpop.eup %860  ;;  %886 = vrcp.f32 %v385_v42  ;;  %v387_v46 = vadd.f32 1.0, %v859_v43  ;;  %v793_v42 = vmul.f32 -1.442695, %v1240_v34  ;;  %v1258_v43 = vld [vmem:[%s1136_s12 + $0xd0] sm:$0xff] }
  0x26   : > { %v863_v47 = vpop.eup %862  ;;  %888 = vrcp.f32 %v386_v44  ;;  %v388_v48 = vadd.f32 1.0, %v861_v45  ;;  %v794_v45 = vmul.f32 -1.442695, %v1246_v37 }
  0x27   : > { %v865_v49 = vpop.eup %864  ;;  %890 = vrcp.f32 %v387_v46  ;;  %v389_v50 = vadd.f32 1.0, %v863_v47  ;;  %v1264_v46 = vld [vmem:[%s1136_s12 + $0xd8] sm:$0xff] }
  0x28   : > { %v867_v51 = vpop.eup %866  ;;  %892 = vrcp.f32 %v388_v48  ;;  %v390_v52 = vadd.f32 1.0, %v865_v49  ;;  %v795_v48 = vmul.f32 -1.442695, %v1252_v40  ;;  %v1270_v49 = vld [vmem:[%s1136_s12 + $0xe0] sm:$0xff] }
  0x29   : > { %v869_v53 = vpop.eup %868  ;;  %894 = vrcp.f32 %v389_v50  ;;  %v391_v54 = vadd.f32 1.0, %v867_v51  ;;  %v796_v51 = vmul.f32 -1.442695, %v1258_v43 }
  0x2a   : > { %v871_v55 = vpop.eup %870  ;;  %896 = vrcp.f32 %v390_v52  ;;  %v392_v56 = vadd.f32 1.0, %v869_v53  ;;  %v1276_v52 = vld [vmem:[%s1136_s12 + $0xe8] sm:$0xff] }
  0x2b   : > { %v873_v58 = vpop.eup %872  ;;  %898 = vrcp.f32 %v391_v54  ;;  %v393_v59 = vadd.f32 1.0, %v871_v55  ;;  %v797_v54 = vmul.f32 -1.442695, %v1264_v46  ;;  %v1282_v55 = vld [vmem:[%s1136_s12 + $0xf0] sm:$0xff] }
  0x2c   : > { %v875_v61 = vpop.eup %874  ;;  %900 = vrcp.f32 %v392_v56  ;;  %v394_v62 = vadd.f32 1.0, %v873_v58  ;;  %v798_v58 = vmul.f32 -1.442695, %v1270_v49 }
  0x2d   : > { %v877_v3 = vpop.eup %876  ;;  %902 = vrcp.f32 %v393_v59  ;;  %v395_v4 = vadd.f32 1.0, %v875_v61  ;;  %v1288_v59 = vld [vmem:[%s1136_s12 + $0xf8] sm:$0xff] }
  0x2e   : > { %v879_v10 = vpop.eup %878  ;;  %904 = vrcp.f32 %v394_v62  ;;  %v396_v11 = vadd.f32 1.0, %v877_v3  ;;  %v799_v62 = vmul.f32 -1.442695, %v1276_v52 }
  0x2f   : > { %v881_v19 = vpop.eup %880  ;;  %v573_v21 = vmul.f32 %v879_v10, %v1139_v0  ;;  %906 = vrcp.f32 %v395_v4 }
  0x30   : > { %v883_v27 = vpop.eup %882  ;;  %v574_v29 = vmul.f32 %v881_v19, %v1142_v1  ;;  %908 = vrcp.f32 %v396_v11 }
  0x31   : > { %v885_v32 = vpop.eup %884  ;;  %637 = vst [vmem:[%s1220_s15] sm:$0xff] %v573_v21  ;;  %v575_v0 = vmul.f32 %v883_v27, %v1145_v2  ;;  %910 = vpow2.f32 %v786_v5 }
  0x32   : > { %v887_v35 = vpop.eup %886  ;;  %638 = vst [vmem:[%s1220_s15 + $0x8] sm:$0xff] %v574_v29  ;;  %v576_v1 = vmul.f32 %v885_v32, %v1151_v6  ;;  %912 = vpow2.f32 %v787_v15 }
  0x33   : > { %v889_v38 = vpop.eup %888  ;;  %639 = vst [vmem:[%s1220_s15 + $0x10] sm:$0xff] %v575_v0  ;;  %v577_v2 = vmul.f32 %v887_v35, %v1154_v7  ;;  %914 = vpow2.f32 %v788_v23 }
  0x34   : > { %v891_v41 = vpop.eup %890  ;;  %640 = vst [vmem:[%s1220_s15 + $0x18] sm:$0xff] %v576_v1  ;;  %v578_v6 = vmul.f32 %v889_v38, %v1157_v8  ;;  %916 = vpow2.f32 %v789_v30 }
  0x35   : > { %v893_v44 = vpop.eup %892  ;;  %641 = vst [vmem:[%s1220_s15 + $0x20] sm:$0xff] %v577_v2  ;;  %v579_v7 = vmul.f32 %v891_v41, %v1163_v12  ;;  %918 = vpow2.f32 %v790_v33 }
  0x36   : > { %v895_v47 = vpop.eup %894  ;;  %642 = vst [vmem:[%s1220_s15 + $0x28] sm:$0xff] %v578_v6  ;;  %v580_v8 = vmul.f32 %v893_v44, %v1166_v13  ;;  %920 = vpow2.f32 %v791_v36 }
  0x37   : > { %v897_v50 = vpop.eup %896  ;;  %643 = vst [vmem:[%s1220_s15 + $0x30] sm:$0xff] %v579_v7  ;;  %v581_v12 = vmul.f32 %v895_v47, %v1169_v14  ;;  %922 = vpow2.f32 %v792_v39 }
  0x38   : > { %v899_v53 = vpop.eup %898  ;;  %644 = vst [vmem:[%s1220_s15 + $0x38] sm:$0xff] %v580_v8  ;;  %v582_v13 = vmul.f32 %v897_v50, %v1174_v17  ;;  %924 = vpow2.f32 %v793_v42  ;;  %v1306_v8 = vld [vmem:[%s1136_s12 + $0x100] sm:$0xff] }
  0x39   : > { %v901_v56 = vpop.eup %900  ;;  %645 = vst [vmem:[%s1220_s15 + $0x40] sm:$0xff] %v581_v12  ;;  %v583_v14 = vmul.f32 %v899_v53, %v1177_v18  ;;  %926 = vpow2.f32 %v794_v45  ;;  %v800_v18 = vmul.f32 -1.442695, %v1282_v55  ;;  %v1309_v12 = vld [vmem:[%s1136_s12 + $0x108] sm:$0xff] }
  0x3a   : > { %v903_v61 = vpop.eup %902  ;;  %646 = vst [vmem:[%s1220_s15 + $0x48] sm:$0xff] %v582_v13  ;;  %v584_v17 = vmul.f32 %v901_v56, %v1181_v20  ;;  %928 = vpow2.f32 %v795_v48  ;;  %v801_v20 = vmul.f32 -1.442695, %v1288_v59  ;;  %v1312_v13 = vld [vmem:[%s1136_s12 + $0x110] sm:$0xff] }
  0x3b   : > { %v905_v3 = vpop.eup %904  ;;  %647 = vst [vmem:[%s1220_s15 + $0x50] sm:$0xff] %v583_v14  ;;  %v585_v4 = vmul.f32 %v903_v61, %v1185_v22  ;;  %930 = vpow2.f32 %v796_v51  ;;  %v802_v14 = vmul.f32 -1.442695, %v1306_v8 }
  0x3c   : > { %v907_v5 = vpop.eup %906  ;;  %648 = vst [vmem:[%s1220_s15 + $0x58] sm:$0xff] %v584_v17  ;;  %v586_v10 = vmul.f32 %v905_v3, %v1189_v24  ;;  %932 = vpow2.f32 %v797_v54  ;;  %v1320_v3 = vld [vmem:[%s1136_s12 + $0x120] sm:$0xff] }
  0x3d   : > { %v909_v11 = vpop.eup %908  ;;  %649 = vst [vmem:[%s1220_s15 + $0x60] sm:$0xff] %v585_v4  ;;  %v587_v15 = vmul.f32 %v907_v5, %v1193_v26  ;;  %934 = vpow2.f32 %v798_v58  ;;  %v1316_v58 = vld [vmem:[%s1136_s12 + $0x118] sm:$0xff]  ;;  %v804_v5 = vmul.f32 -1.442695, %v1312_v13 }
  0x3e   : > { %v911_v19 = vpop.eup %910  ;;  %650 = vst [vmem:[%s1220_s15 + $0x68] sm:$0xff] %v586_v10  ;;  %v588_v22 = vmul.f32 %v909_v11, %v1197_v28  ;;  %936 = vpow2.f32 %v799_v62  ;;  %v803_v62 = vmul.f32 -1.442695, %v1309_v12  ;;  %v1325_v10 = vld [vmem:[%s1136_s12 + $0x128] sm:$0xff] }
  0x3f   : > { %v913_v21 = vpop.eup %912  ;;  %651 = vst [vmem:[%s1220_s15 + $0x70] sm:$0xff] %v587_v15  ;;  %v397_v23 = vadd.f32 1.0, %v911_v19  ;;  %938 = vpow2.f32 %v800_v18  ;;  %v805_v15 = vmul.f32 -1.442695, %v1316_v58  ;;  %v1330_v19 = vld [vmem:[%s1136_s12 + $0x130] sm:$0xff] }
  0x40   : > { %v915_v27 = vpop.eup %914  ;;  %652 = vst [vmem:[%s1220_s15 + $0x78] sm:$0xff] %v588_v22  ;;  %v398_v24 = vadd.f32 1.0, %v913_v21  ;;  %940 = vpow2.f32 %v801_v20  ;;  %v806_v21 = vmul.f32 -1.442695, %v1320_v3 }
  0x41   : > { %v917_v29 = vpop.eup %916  ;;  %942 = vrcp.f32 %v397_v23  ;;  %v399_v30 = vadd.f32 1.0, %v915_v27  ;;  %v1336_v23 = vld [vmem:[%s1136_s12 + $0x138] sm:$0xff] }
  0x42   : > { %v919_v32 = vpop.eup %918  ;;  %944 = vrcp.f32 %v398_v24  ;;  %v400_v26 = vadd.f32 1.0, %v917_v29  ;;  %v807_v24 = vmul.f32 -1.442695, %v1325_v10  ;;  %v1342_v29 = vld [vmem:[%s1136_s12 + $0x140] sm:$0xff] }
  0x43   : > { %v921_v0 = vpop.eup %920  ;;  %946 = vrcp.f32 %v399_v30  ;;  %v401_v33 = vadd.f32 1.0, %v919_v32  ;;  %v808_v32 = vmul.f32 -1.442695, %v1330_v19 }
  0x44   : > { %v923_v35 = vpop.eup %922  ;;  %948 = vrcp.f32 %v400_v26  ;;  %v402_v28 = vadd.f32 1.0, %v921_v0  ;;  %v1348_v26 = vld [vmem:[%s1136_s12 + $0x148] sm:$0xff] }
  0x45   : > { %v925_v1 = vpop.eup %924  ;;  %950 = vrcp.f32 %v401_v33  ;;  %v403_v36 = vadd.f32 1.0, %v923_v35  ;;  %v809_v33 = vmul.f32 -1.442695, %v1336_v23  ;;  %v1354_v35 = vld [vmem:[%s1136_s12 + $0x150] sm:$0xff] }
  0x46   : > { %v927_v38 = vpop.eup %926  ;;  %952 = vrcp.f32 %v402_v28  ;;  %v404_v2 = vadd.f32 1.0, %v925_v1  ;;  %v810_v1 = vmul.f32 -1.442695, %v1342_v29 }
  0x47   : > { %v929_v39 = vpop.eup %928  ;;  %954 = vrcp.f32 %v403_v36  ;;  %v405_v41 = vadd.f32 1.0, %v927_v38  ;;  %v1360_v36 = vld [vmem:[%s1136_s12 + $0x158] sm:$0xff] }
  0x48   : > { %v931_v6 = vpop.eup %930  ;;  %956 = vrcp.f32 %v404_v2  ;;  %v406_v42 = vadd.f32 1.0, %v929_v39  ;;  %v811_v2 = vmul.f32 -1.442695, %v1348_v26  ;;  %v1366_v39 = vld [vmem:[%s1136_s12 + $0x160] sm:$0xff] }
  0x49   : > { %v933_v44 = vpop.eup %932  ;;  %958 = vrcp.f32 %v405_v41  ;;  %v407_v7 = vadd.f32 1.0, %v931_v6  ;;  %v812_v6 = vmul.f32 -1.442695, %v1354_v35 }
  0x4a   : > { %v935_v45 = vpop.eup %934  ;;  %960 = vrcp.f32 %v406_v42  ;;  %v408_v47 = vadd.f32 1.0, %v933_v44  ;;  %v1372_v42 = vld [vmem:[%s1136_s12 + $0x168] sm:$0xff] }
  0x4b   : > { %v937_v48 = vpop.eup %936  ;;  %962 = vrcp.f32 %v407_v7  ;;  %v409_v50 = vadd.f32 1.0, %v935_v45  ;;  %v813_v7 = vmul.f32 -1.442695, %v1360_v36  ;;  %v1378_v45 = vld [vmem:[%s1136_s12 + $0x170] sm:$0xff] }
  0x4c   : > { %v939_v51 = vpop.eup %938  ;;  %964 = vrcp.f32 %v408_v47  ;;  %v410_v53 = vadd.f32 1.0, %v937_v48  ;;  %v814_v48 = vmul.f32 -1.442695, %v1366_v39 }
  0x4d   : > { %v941_v54 = vpop.eup %940  ;;  %966 = vrcp.f32 %v409_v50  ;;  %v411_v56 = vadd.f32 1.0, %v939_v51  ;;  %v1384_v50 = vld [vmem:[%s1136_s12 + $0x178] sm:$0xff] }
  0x4e   : > { %v943_v61 = vpop.eup %942  ;;  %968 = vrcp.f32 %v410_v53  ;;  %v412_v17 = vadd.f32 1.0, %v941_v54  ;;  %v815_v53 = vmul.f32 -1.442695, %v1372_v42 }
  0x4f   : > { %v945_v4 = vpop.eup %944  ;;  %v589_v18 = vmul.f32 %v943_v61, %v1203_v57  ;;  %970 = vrcp.f32 %v411_v56 }
  0x50   : > { %v947_v20 = vpop.eup %946  ;;  %v590_v11 = vmul.f32 %v945_v4, %v1206_v60  ;;  %972 = vrcp.f32 %v412_v17 }
  0x51   : > { %v949_v22 = vpop.eup %948  ;;  %653 = vst [vmem:[%s1220_s15 + $0x80] sm:$0xff] %v589_v18  ;;  %v591_v57 = vmul.f32 %v947_v20, %v1209_v63  ;;  %974 = vpow2.f32 %v802_v14 }
  0x52   : > { %v951_v27 = vpop.eup %950  ;;  %654 = vst [vmem:[%s1220_s15 + $0x88] sm:$0xff] %v590_v11  ;;  %v592_v60 = vmul.f32 %v949_v22, %v1213_v9  ;;  %976 = vpow2.f32 %v803_v62 }
  0x53   : > { %v953_v30 = vpop.eup %952  ;;  %655 = vst [vmem:[%s1220_s15 + $0x90] sm:$0xff] %v591_v57  ;;  %v593_v63 = vmul.f32 %v951_v27, %v1224_v16  ;;  %978 = vpow2.f32 %v804_v5 }
  0x54   : > { %v955_v0 = vpop.eup %954  ;;  %656 = vst [vmem:[%s1220_s15 + $0x98] sm:$0xff] %v592_v60  ;;  %v594_v9 = vmul.f32 %v953_v30, %v1229_v25  ;;  %980 = vpow2.f32 %v805_v15 }
  0x55   : > { %v957_v28 = vpop.eup %956  ;;  %657 = vst [vmem:[%s1220_s15 + $0xa0] sm:$0xff] %v593_v63  ;;  %v595_v16 = vmul.f32 %v955_v0, %v1234_v31  ;;  %982 = vpow2.f32 %v806_v21 }
  0x56   : > { %v959_v38 = vpop.eup %958  ;;  %658 = vst [vmem:[%s1220_s15 + $0xa8] sm:$0xff] %v594_v9  ;;  %v596_v25 = vmul.f32 %v957_v28, %v1240_v34  ;;  %984 = vpow2.f32 %v807_v24 }
  0x57   : > { %v961_v41 = vpop.eup %960  ;;  %659 = vst [vmem:[%s1220_s15 + $0xb0] sm:$0xff] %v595_v16  ;;  %v597_v31 = vmul.f32 %v959_v38, %v1246_v37  ;;  %986 = vpow2.f32 %v808_v32 }
  0x58   : > { %v963_v44 = vpop.eup %962  ;;  %660 = vst [vmem:[%s1220_s15 + $0xb8] sm:$0xff] %v596_v25  ;;  %v598_v34 = vmul.f32 %v961_v41, %v1252_v40  ;;  %988 = vpow2.f32 %v809_v33  ;;  %v1402_v25 = vld [vmem:[%s1136_s12 + $0x180] sm:$0xff] }
  0x59   : > { %v965_v47 = vpop.eup %964  ;;  %661 = vst [vmem:[%s1220_s15 + $0xc0] sm:$0xff] %v597_v31  ;;  %v599_v37 = vmul.f32 %v963_v44, %v1258_v43  ;;  %990 = vpow2.f32 %v810_v1  ;;  %v816_v43 = vmul.f32 -1.442695, %v1378_v45  ;;  %v1405_v31 = vld [vmem:[%s1136_s12 + $0x188] sm:$0xff] }
  0x5a   : > { %v967_v51 = vpop.eup %966  ;;  %662 = vst [vmem:[%s1220_s15 + $0xc8] sm:$0xff] %v598_v34  ;;  %v600_v40 = vmul.f32 %v965_v47, %v1264_v46  ;;  %992 = vpow2.f32 %v811_v2  ;;  %v817_v46 = vmul.f32 -1.442695, %v1384_v50  ;;  %v1408_v34 = vld [vmem:[%s1136_s12 + $0x190] sm:$0xff] }
  0x5b   : > { %v969_v54 = vpop.eup %968  ;;  %663 = vst [vmem:[%s1220_s15 + $0xd0] sm:$0xff] %v599_v37  ;;  %v601_v56 = vmul.f32 %v967_v51, %v1270_v49  ;;  %994 = vpow2.f32 %v812_v6  ;;  %v818_v37 = vmul.f32 -1.442695, %v1402_v25 }
  0x5c   : > { %v971_v14 = vpop.eup %970  ;;  %664 = vst [vmem:[%s1220_s15 + $0xd8] sm:$0xff] %v600_v40  ;;  %v602_v61 = vmul.f32 %v969_v54, %v1276_v52  ;;  %996 = vpow2.f32 %v813_v7  ;;  %v1416_v54 = vld [vmem:[%s1136_s12 + $0x1a0] sm:$0xff] }
  0x5d   : > { %v973_v17 = vpop.eup %972  ;;  %665 = vst [vmem:[%s1220_s15 + $0xe0] sm:$0xff] %v601_v56  ;;  %v603_v62 = vmul.f32 %v971_v14, %v1282_v55  ;;  %998 = vpow2.f32 %v814_v48  ;;  %v1412_v48 = vld [vmem:[%s1136_s12 + $0x198] sm:$0xff]  ;;  %v820_v14 = vmul.f32 -1.442695, %v1408_v34 }
  0x5e   : > { %v975_v4 = vpop.eup %974  ;;  %666 = vst [vmem:[%s1220_s15 + $0xe8] sm:$0xff] %v602_v61  ;;  %v604_v49 = vmul.f32 %v973_v17, %v1288_v59  ;;  %1000 = vpow2.f32 %v815_v53  ;;  %v819_v53 = vmul.f32 -1.442695, %v1405_v31  ;;  %v1421_v61 = vld [vmem:[%s1136_s12 + $0x1a8] sm:$0xff] }
  0x5f   : > { %v977_v18 = vpop.eup %976  ;;  %667 = vst [vmem:[%s1220_s15 + $0xf0] sm:$0xff] %v603_v62  ;;  %v413_v5 = vadd.f32 1.0, %v975_v4  ;;  %1002 = vpow2.f32 %v816_v43  ;;  %v821_v62 = vmul.f32 -1.442695, %v1412_v48  ;;  %v1426_v4 = vld [vmem:[%s1136_s12 + $0x1b0] sm:$0xff] }
  0x60   : > { %v979_v20 = vpop.eup %978  ;;  %668 = vst [vmem:[%s1220_s15 + $0xf8] sm:$0xff] %v604_v49  ;;  %v414_v52 = vadd.f32 1.0, %v977_v18  ;;  %1004 = vpow2.f32 %v817_v46  ;;  %v822_v18 = vmul.f32 -1.442695, %v1416_v54 }
  0x61   : > { %v981_v11 = vpop.eup %980  ;;  %1006 = vrcp.f32 %v413_v5  ;;  %v415_v15 = vadd.f32 1.0, %v979_v20  ;;  %v1432_v5 = vld [vmem:[%s1136_s12 + $0x1b8] sm:$0xff] }
  0x62   : > { %v983_v22 = vpop.eup %982  ;;  %1008 = vrcp.f32 %v414_v52  ;;  %v416_v55 = vadd.f32 1.0, %v981_v11  ;;  %v823_v52 = vmul.f32 -1.442695, %v1421_v61  ;;  %v1438_v11 = vld [vmem:[%s1136_s12 + $0x1c0] sm:$0xff] }
  0x63   : > { %v985_v57 = vpop.eup %984  ;;  %1010 = vrcp.f32 %v415_v15  ;;  %v417_v21 = vadd.f32 1.0, %v983_v22  ;;  %v824_v22 = vmul.f32 -1.442695, %v1426_v4 }
  0x64   : > { %v987_v27 = vpop.eup %986  ;;  %1012 = vrcp.f32 %v416_v55  ;;  %v418_v59 = vadd.f32 1.0, %v985_v57  ;;  %v1444_v55 = vld [vmem:[%s1136_s12 + $0x1c8] sm:$0xff] }
  0x65   : > { %v989_v60 = vpop.eup %988  ;;  %1014 = vrcp.f32 %v417_v21  ;;  %v419_v24 = vadd.f32 1.0, %v987_v27  ;;  %v825_v21 = vmul.f32 -1.442695, %v1432_v5  ;;  %v1450_v27 = vld [vmem:[%s1136_s12 + $0x1d0] sm:$0xff] }
  0x66   : > { %v991_v30 = vpop.eup %990  ;;  %1016 = vrcp.f32 %v418_v59  ;;  %v420_v63 = vadd.f32 1.0, %v989_v60  ;;  %v826_v60 = vmul.f32 -1.442695, %v1438_v11 }
  0x67   : > { %v993_v32 = vpop.eup %992  ;;  %1018 = vrcp.f32 %v419_v24  ;;  %v421_v0 = vadd.f32 1.0, %v991_v30  ;;  %v1456_v24 = vld [vmem:[%s1136_s12 + $0x1d8] sm:$0xff] }
  0x68   : > { %v995_v9 = vpop.eup %994  ;;  %1020 = vrcp.f32 %v420_v63  ;;  %v422_v33 = vadd.f32 1.0, %v993_v32  ;;  %v827_v63 = vmul.f32 -1.442695, %v1444_v55  ;;  %v1462_v32 = vld [vmem:[%s1136_s12 + $0x1e0] sm:$0xff] }
  0x69   : > { %v997_v28 = vpop.eup %996  ;;  %1022 = vrcp.f32 %v421_v0  ;;  %v423_v16 = vadd.f32 1.0, %v995_v9  ;;  %v828_v9 = vmul.f32 -1.442695, %v1450_v27 }
  0x6a   : > { %v999_v1 = vpop.eup %998  ;;  %1024 = vrcp.f32 %v422_v33  ;;  %v424_v38 = vadd.f32 1.0, %v997_v28  ;;  %v1468_v33 = vld [vmem:[%s1136_s12 + $0x1e8] sm:$0xff] }
  0x6b   : > { %v1001_v2 = vpop.eup %1000  ;;  %1026 = vrcp.f32 %v423_v16  ;;  %v425_v41 = vadd.f32 1.0, %v999_v1  ;;  %v829_v16 = vmul.f32 -1.442695, %v1456_v24  ;;  %v1474_v1 = vld [vmem:[%s1136_s12 + $0x1f0] sm:$0xff] }
  0x6c   : > { %v1003_v6 = vpop.eup %1002  ;;  %1028 = vrcp.f32 %v424_v38  ;;  %v426_v44 = vadd.f32 1.0, %v1001_v2  ;;  %v830_v2 = vmul.f32 -1.442695, %v1462_v32 }
  0x6d   : > { %v1005_v7 = vpop.eup %1004  ;;  %1030 = vrcp.f32 %v425_v41  ;;  %v427_v47 = vadd.f32 1.0, %v1003_v6  ;;  %v1480_v41 = vld [vmem:[%s1136_s12 + $0x1f8] sm:$0xff] }
  0x6e   : > { %v1007_v51 = vpop.eup %1006  ;;  %1032 = vrcp.f32 %v426_v44  ;;  %v428_v40 = vadd.f32 1.0, %v1005_v7  ;;  %v831_v44 = vmul.f32 -1.442695, %v1468_v33 }
  0x6f   : > { %v1009_v56 = vpop.eup %1008  ;;  %v605_v43 = vmul.f32 %v1007_v51, %v1306_v8  ;;  %1034 = vrcp.f32 %v427_v47 }
  0x70   : > { %v1011_v46 = vpop.eup %1010  ;;  %v606_v17 = vmul.f32 %v1009_v56, %v1309_v12  ;;  %1036 = vrcp.f32 %v428_v40 }
  0x71   : > { %v1013_v49 = vpop.eup %1012  ;;  %669 = vst [vmem:[%s1220_s15 + $0x100] sm:$0xff] %v605_v43  ;;  %v607_v8 = vmul.f32 %v1011_v46, %v1312_v13  ;;  %1038 = vpow2.f32 %v818_v37 }
  0x72   : > { %v1015_v20 = vpop.eup %1014  ;;  %670 = vst [vmem:[%s1220_s15 + $0x108] sm:$0xff] %v606_v17  ;;  %v608_v12 = vmul.f32 %v1013_v49, %v1316_v58  ;;  %1040 = vpow2.f32 %v819_v53 }
  0x73   : > { %v1017_v15 = vpop.eup %1016  ;;  %671 = vst [vmem:[%s1220_s15 + $0x110] sm:$0xff] %v607_v8  ;;  %v609_v13 = vmul.f32 %v1015_v20, %v1320_v3  ;;  %1042 = vpow2.f32 %v820_v14 }
  0x74   : > { %v1019_v57 = vpop.eup %1018  ;;  %672 = vst [vmem:[%s1220_s15 + $0x118] sm:$0xff] %v608_v12  ;;  %v610_v58 = vmul.f32 %v1017_v15, %v1325_v10  ;;  %1044 = vpow2.f32 %v821_v62 }
  0x75   : > { %v1021_v59 = vpop.eup %1020  ;;  %673 = vst [vmem:[%s1220_s15 + $0x120] sm:$0xff] %v609_v13  ;;  %v611_v3 = vmul.f32 %v1019_v57, %v1330_v19  ;;  %1046 = vpow2.f32 %v822_v18 }
  0x76   : > { %v1023_v30 = vpop.eup %1022  ;;  %674 = vst [vmem:[%s1220_s15 + $0x128] sm:$0xff] %v610_v58  ;;  %v612_v10 = vmul.f32 %v1021_v59, %v1336_v23  ;;  %1048 = vpow2.f32 %v823_v52 }
  0x77   : > { %v1025_v0 = vpop.eup %1024  ;;  %675 = vst [vmem:[%s1220_s15 + $0x130] sm:$0xff] %v611_v3  ;;  %v613_v19 = vmul.f32 %v1023_v30, %v1342_v29  ;;  %1050 = vpow2.f32 %v824_v22 }
  0x78   : > { %v1027_v28 = vpop.eup %1026  ;;  %676 = vst [vmem:[%s1220_s15 + $0x138] sm:$0xff] %v612_v10  ;;  %v614_v23 = vmul.f32 %v1025_v0, %v1348_v26  ;;  %1052 = vpow2.f32 %v825_v21 }
  0x79   : > { %v1029_v38 = vpop.eup %1028  ;;  %677 = vst [vmem:[%s1220_s15 + $0x140] sm:$0xff] %v613_v19  ;;  %v615_v29 = vmul.f32 %v1027_v28, %v1354_v35  ;;  %1054 = vpow2.f32 %v826_v60  ;;  %v832_v35 = vmul.f32 -1.442695, %v1474_v1 }
  0x7a   : > { %v1031_v6 = vpop.eup %1030  ;;  %678 = vst [vmem:[%s1220_s15 + $0x148] sm:$0xff] %v614_v23  ;;  %v616_v26 = vmul.f32 %v1029_v38, %v1360_v36  ;;  %1056 = vpow2.f32 %v827_v63  ;;  %v833_v36 = vmul.f32 -1.442695, %v1480_v41 }
  0x7b   : > { %v1033_v7 = vpop.eup %1032  ;;  %679 = vst [vmem:[%s1220_s15 + $0x150] sm:$0xff] %v615_v29  ;;  %v617_v47 = vmul.f32 %v1031_v6, %v1366_v39  ;;  %1058 = vpow2.f32 %v828_v9 }
  0x7c   : > { %v1035_v37 = vpop.eup %1034  ;;  %680 = vst [vmem:[%s1220_s15 + $0x158] sm:$0xff] %v616_v26  ;;  %v618_v51 = vmul.f32 %v1033_v7, %v1372_v42  ;;  %1060 = vpow2.f32 %v829_v16 }
  0x7d   : > { %v1037_v40 = vpop.eup %1036  ;;  %681 = vst [vmem:[%s1220_s15 + $0x160] sm:$0xff] %v617_v47  ;;  %v619_v53 = vmul.f32 %v1035_v37, %v1378_v45  ;;  %1062 = vpow2.f32 %v830_v2 }
  0x7e   : > { %v1039_v56 = vpop.eup %1038  ;;  %682 = vst [vmem:[%s1220_s15 + $0x168] sm:$0xff] %v618_v51  ;;  %v620_v39 = vmul.f32 %v1037_v40, %v1384_v50  ;;  %1064 = vpow2.f32 %v831_v44 }
  0x7f   : > { %v1041_v43 = vpop.eup %1040  ;;  %683 = vst [vmem:[%s1220_s15 + $0x170] sm:$0xff] %v619_v53  ;;  %v429_v14 = vadd.f32 1.0, %v1039_v56  ;;  %1066 = vpow2.f32 %v832_v35 }
  0x80   : > { %v1043_v46 = vpop.eup %1042  ;;  %684 = vst [vmem:[%s1220_s15 + $0x178] sm:$0xff] %v620_v39  ;;  %v430_v42 = vadd.f32 1.0, %v1041_v43  ;;  %1068 = vpow2.f32 %v833_v36 }
  0x81   : > { %v1045_v17 = vpop.eup %1044  ;;  %1070 = vrcp.f32 %v429_v14  ;;  %v431_v62 = vadd.f32 1.0, %v1043_v46 }
  0x82   : > { %v1047_v49 = vpop.eup %1046  ;;  %1072 = vrcp.f32 %v430_v42  ;;  %v432_v45 = vadd.f32 1.0, %v1045_v17 }
  0x83   : > { %v1049_v8 = vpop.eup %1048  ;;  %1074 = vrcp.f32 %v431_v62  ;;  %v433_v18 = vadd.f32 1.0, %v1047_v49 }
  0x84   : > { %v1051_v20 = vpop.eup %1050  ;;  %1076 = vrcp.f32 %v432_v45  ;;  %v434_v50 = vadd.f32 1.0, %v1049_v8 }
  0x85   : > { %v1053_v12 = vpop.eup %1052  ;;  %1078 = vrcp.f32 %v433_v18  ;;  %v435_v52 = vadd.f32 1.0, %v1051_v20 }
  0x86   : > { %v1055_v15 = vpop.eup %1054  ;;  %1080 = vrcp.f32 %v434_v50  ;;  %v436_v13 = vadd.f32 1.0, %v1053_v12 }
  0x87   : > { %v1057_v22 = vpop.eup %1056  ;;  %1082 = vrcp.f32 %v435_v52  ;;  %v437_v57 = vadd.f32 1.0, %v1055_v15 }
  0x88   : > { %v1059_v58 = vpop.eup %1058  ;;  %1084 = vrcp.f32 %v436_v13  ;;  %v438_v21 = vadd.f32 1.0, %v1057_v22 }
  0x89   : > { %v1061_v59 = vpop.eup %1060  ;;  %1086 = vrcp.f32 %v437_v57  ;;  %v439_v3 = vadd.f32 1.0, %v1059_v58 }
  0x8a   : > { %v1063_v60 = vpop.eup %1062  ;;  %1088 = vrcp.f32 %v438_v21  ;;  %v440_v30 = vadd.f32 1.0, %v1061_v59 }
  0x8b   : > { %v1065_v10 = vpop.eup %1064  ;;  %1090 = vrcp.f32 %v439_v3  ;;  %v441_v63 = vadd.f32 1.0, %v1063_v60 }
  0x8c   : > { %v1067_v0 = vpop.eup %1066  ;;  %1092 = vrcp.f32 %v440_v30  ;;  %v442_v19 = vadd.f32 1.0, %v1065_v10 }
  0x8d   : > { %v1069_v9 = vpop.eup %1068  ;;  %1094 = vrcp.f32 %v441_v63  ;;  %v443_v28 = vadd.f32 1.0, %v1067_v0 }
  0x8e   : > { %v1071_v23 = vpop.eup %1070  ;;  %1096 = vrcp.f32 %v442_v19  ;;  %v444_v16 = vadd.f32 1.0, %v1069_v9 }
  0x8f   : > { %v1073_v38 = vpop.eup %1072  ;;  %v621_v29 = vmul.f32 %v1071_v23, %v1402_v25  ;;  %1098 = vrcp.f32 %v443_v28 }
  0x90   : > { %v1075_v2 = vpop.eup %1074  ;;  %v622_v6 = vmul.f32 %v1073_v38, %v1405_v31  ;;  %1100 = vrcp.f32 %v444_v16 }
  0x91   : > { %v1077_v26 = vpop.eup %1076  ;;  %685 = vst [vmem:[%s1220_s15 + $0x180] sm:$0xff] %v621_v29  ;;  %v623_v44 = vmul.f32 %v1075_v2, %v1408_v34 }
  0x92   : > { %v1079_v7 = vpop.eup %1078  ;;  %686 = vst [vmem:[%s1220_s15 + $0x188] sm:$0xff] %v622_v6  ;;  %v624_v47 = vmul.f32 %v1077_v26, %v1412_v48 }
  0x93   : > { %v1081_v35 = vpop.eup %1080  ;;  %687 = vst [vmem:[%s1220_s15 + $0x190] sm:$0xff] %v623_v44  ;;  %v625_v25 = vmul.f32 %v1079_v7, %v1416_v54 }
  0x94   : > { %v1083_v37 = vpop.eup %1082  ;;  %688 = vst [vmem:[%s1220_s15 + $0x198] sm:$0xff] %v624_v47  ;;  %v626_v31 = vmul.f32 %v1081_v35, %v1421_v61 }
  0x95   : > { %v1085_v51 = vpop.eup %1084  ;;  %689 = vst [vmem:[%s1220_s15 + $0x1a0] sm:$0xff] %v625_v25  ;;  %v627_v34 = vmul.f32 %v1083_v37, %v1426_v4 }
  0x96   : > { %v1087_v36 = vpop.eup %1086  ;;  %690 = vst [vmem:[%s1220_s15 + $0x1a8] sm:$0xff] %v626_v31  ;;  %v628_v48 = vmul.f32 %v1085_v51, %v1432_v5 }
  0x97   : > { %v1089_v40 = vpop.eup %1088  ;;  %691 = vst [vmem:[%s1220_s15 + $0x1b0] sm:$0xff] %v627_v34  ;;  %v629_v54 = vmul.f32 %v1087_v36, %v1438_v11 }
  0x98   : > { %v1091_v53 = vpop.eup %1090  ;;  %692 = vst [vmem:[%s1220_s15 + $0x1b8] sm:$0xff] %v628_v48  ;;  %v630_v61 = vmul.f32 %v1089_v40, %v1444_v55 }
  0x99   : > { %v1093_v56 = vpop.eup %1092  ;;  %693 = vst [vmem:[%s1220_s15 + $0x1c0] sm:$0xff] %v629_v54  ;;  %v631_v4 = vmul.f32 %v1091_v53, %v1450_v27 }
  0x9a   : > { %v1095_v39 = vpop.eup %1094  ;;  %694 = vst [vmem:[%s1220_s15 + $0x1c8] sm:$0xff] %v630_v61  ;;  %v632_v5 = vmul.f32 %v1093_v56, %v1456_v24 }
  0x9b   : > { %v1097_v43 = vpop.eup %1096  ;;  %695 = vst [vmem:[%s1220_s15 + $0x1d0] sm:$0xff] %v631_v4  ;;  %v633_v11 = vmul.f32 %v1095_v39, %v1462_v32 }
  0x9c   : > { %v1099_v14 = vpop.eup %1098  ;;  %696 = vst [vmem:[%s1220_s15 + $0x1d8] sm:$0xff] %v632_v5  ;;  %v634_v46 = vmul.f32 %v1097_v43, %v1468_v33 }
  0x9d   : > { %v1101_v55 = vpop.eup %1100  ;;  %697 = vst [vmem:[%s1220_s15 + $0x1e0] sm:$0xff] %v633_v11  ;;  %v635_v42 = vmul.f32 %v1099_v14, %v1474_v1 }
  0x9e   : > { %698 = vst [vmem:[%s1220_s15 + $0x1e8] sm:$0xff] %v634_v46  ;;  %v636_v27 = vmul.f32 %v1101_v55, %v1480_v41 }
  0x9f   : > { %699 = vst [vmem:[%s1220_s15 + $0x1f0] sm:$0xff] %v635_v42 }
  0xa0   : > { %700 = vst [vmem:[%s1220_s15 + $0x1f8] sm:$0xff] %v636_v27 }
  0xa1 PF: > { %s11_s6 = sadd.s32 1, %s1108_s6  }
  0xa2   : > { %p8_p4 = scmp.ge.s32.totalorder %s11_s6, 6  }
  0xa4   :  { %10 = sbr.rel (!%p8_p4) target bundleno = 1 (0x1), region = 54 }

</bundles_post_ra>
